<compile_context>
chip_gen: v5e
topology: v5e:2x2
jax: 0.10.0
libtpu: 0.0.40
codegen_flags: <defaults>
</compile_context>

<pallas_src>
import functools

import jax
import jax.numpy as jnp
import numpy as np
from jax.experimental import pallas as pl
from jax.experimental.pallas import tpu as pltpu

LANES = 128


def _round_up(x, m):
    return ((x + m - 1) // m) * m


# ----------------------------------------------------------------------------
# Parameter init (deterministic, mirrors nn.Linear default uniform init bounds)
# ----------------------------------------------------------------------------
def init_linear_params(key, d_in, d_out):
    kw, kb = jax.random.split(key)
    bound = 1.0 / np.sqrt(d_in)
    w = jax.random.uniform(kw, (d_in, d_out), jnp.float32, -bound, bound)
    b = jax.random.uniform(kb, (1, d_out), jnp.float32, -bound, bound)
    return (w, b)


def init_mlp_params(key, latent_dim, action_dim, net_dims=()):
    dims = [latent_dim, *net_dims, action_dim]
    keys = jax.random.split(key, len(dims) - 1)
    return [init_linear_params(k, dims[i], dims[i + 1]) for i, k in enumerate(keys)]


# ----------------------------------------------------------------------------
# Host-side packing: all heads -> one weight slab + one bias slab + static
# per-stage activation column intervals.
# ----------------------------------------------------------------------------
def _merge_intervals(ivals):
    if not ivals:
        return ()
    ivals = sorted(ivals)
    out = [list(ivals[0])]
    for lo, hi in ivals[1:]:
        if lo <= out[-1][1]:
            out[-1][1] = max(out[-1][1], hi)
        else:
            out.append([lo, hi])
    return tuple((lo, hi) for lo, hi in out)


def _pack_heads(heads, latent_dim):
    """heads: list of (layer_params, final_act), final_act in {"none", "tanh"}.

    Returns:
      w_all:   (n_stages*P, P) f32, stage s weights in rows [s*P, (s+1)*P).
               Stage 0 rows are laid out per head: rows [h*latent_dim, (h+1)*latent_dim).
      b_all:   (n_stages, P) f32 biases.
      relu_iv / tanh_iv: per-stage tuples of merged (lo, hi) column intervals (static).
      head_cols: (offset, width) of each head's columns in the final output slab.
      P, n_stages
    """
    n = len(heads)
    depths = [len(p) for p, _ in heads]
    n_stages = max(depths)
    for params, _ in heads:
        assert np.asarray(params[0][0]).shape[0] == latent_dim

    # Pre-compute per-stage output widths to size the common pad width P.
    stage_out_ws = []
    widths = [latent_dim] * n
    for s in range(n_stages):
        ows = []
        for h, (params, _) in enumerate(heads):
            ows.append(np.asarray(params[s][0]).shape[1] if s < depths[h] else widths[h])
        stage_out_ws.append(ows)
        widths = ows
    P = max(_round_up(n * latent_dim, LANES),
            max(_round_up(int(sum(ows)), LANES) for ows in stage_out_ws))

    w_all = np.zeros((n_stages * P, P), np.float32)
    b_all = np.zeros((n_stages, P), np.float32)
    relu_iv = [[] for _ in range(n_stages)]
    tanh_iv = [[] for _ in range(n_stages)]

    in_offs = [h * latent_dim for h in range(n)]
    in_ws = [latent_dim] * n
    for s in range(n_stages):
        ows = stage_out_ws[s]
        out_offs = np.concatenate([[0], np.cumsum(ows)[:-1]]).astype(int).tolist()
        for h, (params, fact) in enumerate(heads):
            io, iw, oo, ow = in_offs[h], in_ws[h], out_offs[h], ows[h]
            if s < depths[h]:
                w, b = params[s]
                w = np.asarray(w, np.float32)
                b = np.asarray(b, np.float32).reshape(-1)
                w_all[s * P + io: s * P + io + iw, oo:oo + ow] = w
                b_all[s, oo:oo + ow] = b
                act = "relu" if s < depths[h] - 1 else fact
            else:  # head already finished: identity pass-through
                w_all[s * P + io: s * P + io + iw, oo:oo + ow] = np.eye(iw, dtype=np.float32)
                act = "none"
            if act == "relu":
                relu_iv[s].append((oo, oo + ow))
            elif act == "tanh":
                tanh_iv[s].append((oo, oo + ow))
        in_offs, in_ws = out_offs, ows

    relu_iv = tuple(_merge_intervals(v) for v in relu_iv)
    tanh_iv = tuple(_merge_intervals(v) for v in tanh_iv)
    # sanity: relu and tanh columns must never overlap (would silently compute tanh(relu(y)))
    for s in range(n_stages):
        rc = set(c for lo, hi in relu_iv[s] for c in range(lo, hi))
        tc = set(c for lo, hi in tanh_iv[s] for c in range(lo, hi))
        assert not (rc & tc), f"stage {s}: overlapping relu/tanh columns"

    head_cols = tuple((in_offs[h], in_ws[h]) for h in range(n))
    return w_all, b_all, relu_iv, tanh_iv, head_cols, P, n_stages


# ----------------------------------------------------------------------------
# Fused Pallas kernel: every head, every layer, one launch
# ----------------------------------------------------------------------------
def _col_mask(shape, intervals):
    col = jax.lax.broadcasted_iota(jnp.int32, shape, dimension=1)
    mask = None
    for lo, hi in intervals:
        m = (col >= lo) & (col < hi)
        mask = m if mask is None else (mask | m)
    return mask


def _apply_acts(y, relu_intervals, tanh_intervals):
    if relu_intervals:  # static skip when empty
        y = jnp.where(_col_mask(y.shape, relu_intervals), jnp.maximum(y, 0.0), y)
    if tanh_intervals:  # static skip when empty (e.g. stage 0 — saves all EUP tanh ops there)
        y = jnp.where(_col_mask(y.shape, tanh_intervals), jnp.tanh(y), y)
    return y


def _fused_heads_kernel(*refs, n_heads, latent_dim, P, n_stages, relu_iv, tanh_iv):
    # refs = (lat_0 ... lat_{H-1}, w_all, b_all, out); all resident in VMEM.
    lat_refs = refs[:n_heads]
    w_ref, b_ref, o_ref = refs[n_heads], refs[n_heads + 1], refs[n_heads + 2]

    # ---- stage 0: block-diagonal first layer as per-head accumulated matmuls (no input concat) ----
    y = jnp.dot(lat_refs[0][...], w_ref[0:latent_dim, :],
                preferred_element_type=jnp.float32)
    for h in range(1, n_heads):
        y = y + jnp.dot(lat_refs[h][...],
                        w_ref[h * latent_dim:(h + 1) * latent_dim, :],
                        preferred_element_type=jnp.float32)
    y = y + b_ref[0:1, :]
    y = _apply_acts(y, relu_iv[0], tanh_iv[0])

    # ---- remaining stages: one lane-dense (tb, P) @ (P, P) matmul each ----
    for s in range(1, n_stages):  # static Python loop -> fully unrolled
        y = jnp.dot(y, w_ref[s * P:(s + 1) * P, :],
                    preferred_element_type=jnp.float32) + b_ref[s:s + 1, :]
        y = _apply_acts(y, relu_iv[s], tanh_iv[s])

    o_ref[...] = y.astype(o_ref.dtype)  # lane-dense (tb, P) store, no vst.msk


def _pick_batch_tile(B):
    # Tile the batch only when it is big enough to matter; tiles stay tiny vs VMEM
    # (<= 512*128*4 B per in/out slab) so they are safe even on v7x's 64 MiB VMEM.
    for tb in (512, 256, 128):
        if B > tb and B % tb == 0:
            return tb
    return B


# ----------------------------------------------------------------------------
# Module builder: flattens the nested head structure, packs weights, returns
# a jit-compiled forward with the exact (discrete_out, parameter_outs) layout.
# ----------------------------------------------------------------------------
def make_parametrized_action_net(discrete_params, parameter_nets, latent_dim):
    heads = [(discrete_params, "none")]
    structure = []  # how to reassemble parameter_outs from the flat head list
    for spec in parameter_nets:
        kind = spec[0]
        if kind in ("discrete", "continuous"):
            heads.append((spec[1], "tanh" if kind == "continuous" else "none"))
            structure.append(("single", len(heads) - 1))
        elif kind == "hybrid":
            idxs = []
            for params, k in spec[1]:
                heads.append((params, "tanh" if k == "continuous" else "none"))
                idxs.append(len(heads) - 1)
            structure.append(("hybrid", idxs))
        else:
            raise ValueError(kind)

    (w_all_np, b_all_np, relu_iv, tanh_iv, head_cols, P, n_stages) = _pack_heads(heads, latent_dim)
    n_heads = len(heads)
    w_all = jnp.asarray(w_all_np)
    b_all = jnp.asarray(b_all_np)

    kernel = functools.partial(
        _fused_heads_kernel, n_heads=n_heads, latent_dim=latent_dim,
        P=P, n_stages=n_stages, relu_iv=relu_iv, tanh_iv=tanh_iv)

    # honest cost estimate: real layer flops only, tanh counted only where the kernel computes it
    real_flops_per_row = sum(2 * np.asarray(w).shape[0] * np.asarray(w).shape[1]
                             for params, _ in heads for (w, _b) in params)
    n_tanh_stages = sum(1 for iv in tanh_iv if iv)

    @jax.jit
    def _forward_flat(w_all, b_all, *lats):
        B = lats[0].shape[0]
        tb = _pick_batch_tile(B)
        grid = (B // tb,)
        in_specs = (
            [pl.BlockSpec((tb, latent_dim), lambda i: (i, 0)) for _ in range(n_heads)]
            + [pl.BlockSpec(w_all.shape, lambda i: (0, 0)),
               pl.BlockSpec(b_all.shape, lambda i: (0, 0))])
        out_specs = pl.BlockSpec((tb, P), lambda i: (i, 0))
        nbytes = (sum(l.size for l in lats) + w_all.size + b_all.size + B * P) * 4

        out = pl.pallas_call(
            kernel,
            out_shape=jax.ShapeDtypeStruct((B, P), jnp.float32),
            grid=grid,
            in_specs=in_specs,
            out_specs=out_specs,
            compiler_params=pltpu.CompilerParams(
                dimension_semantics=("parallel",)),  # batch tiles split across TCs on v7x
            cost_estimate=pl.CostEstimate(
                flops=B * real_flops_per_row,
                transcendentals=B * P * n_tanh_stages,
                bytes_accessed=nbytes),
        )(*lats, w_all, b_all)
        # per-head slices of the lane-dense slab (fused into the same XLA program)
        return tuple(out[:, off:off + w] for off, w in head_cols)

    def _flatten_latents(latent):
        latent_discrete, latent_parameters = latent
        assert len(latent_parameters) == len(structure)
        flat = [latent_discrete]
        for (kind, _idx), lat in zip(structure, latent_parameters):
            if kind == "single":
                flat.append(lat)
            else:
                flat.extend(lat)
        return flat

    def apply(latent):
        head_outs = _forward_flat(w_all, b_all, *_flatten_latents(latent))
        discrete_out = head_outs[0]
        parameter_outs = []
        for kind, idx in structure:
            if kind == "single":
                parameter_outs.append(head_outs[idx])
            else:
                parameter_outs.append([head_outs[i] for i in idx])
        return discrete_out, parameter_outs

    return apply


# ----------------------------------------------------------------------------
# Pure-jnp reference for correctness check
# ----------------------------------------------------------------------------
def _ref_mlp(params, x, final_activation):
    for (w, b) in params[:-1]:
        x = jnp.maximum(x @ w + b, 0.0)
    w, b = params[-1]
    y = x @ w + b
    return jnp.tanh(y) if final_activation == "tanh" else y


if __name__ == "__main__":
    key = jax.random.PRNGKey(0)
    B = 8            # batch
    LATENT = 32      # latent_dim

    k_params, k_inputs = jax.random.split(key)
    kd, kp0, kh_d, kh_c = jax.random.split(k_params, 4)

    # discrete_action_net: DiscreteActionNet(latent_dim=32, action_dim=5, net_dims=(32,))
    discrete_params = init_mlp_params(kd, LATENT, 5, net_dims=(32,))

    # hybrid_parameter_action_nets:
    #   [0] ContinuousActionNet(32, 3, net_dims=(32,))           -> tanh output
    #   [1] HybridActionNet([DiscreteActionNet(32, 4, ()),       -> linear output
    #                        ContinuousActionNet(32, 2, (32,))]) -> tanh output
    param_net0 = ("continuous", init_mlp_params(kp0, LATENT, 3, net_dims=(32,)))
    hybrid_sub = [
        (init_mlp_params(kh_d, LATENT, 4, net_dims=()), "discrete"),
        (init_mlp_params(kh_c, LATENT, 2, net_dims=(32,)), "continuous"),
    ]
    param_net1 = ("hybrid", hybrid_sub)
    parameter_nets = [param_net0, param_net1]

    # inputs: latent = (latent_discrete, [latent_p0, [latent_h0, latent_h1]])
    ki0, ki1, ki2, ki3 = jax.random.split(k_inputs, 4)
    latent_discrete = jax.random.normal(ki0, (B, LATENT), jnp.float32)
    latent_p0 = jax.random.normal(ki1, (B, LATENT), jnp.float32)
    latent_h0 = jax.random.normal(ki2, (B, LATENT), jnp.float32)
    latent_h1 = jax.random.normal(ki3, (B, LATENT), jnp.float32)
    latent = (latent_discrete, [latent_p0, [latent_h0, latent_h1]])

    net = make_parametrized_action_net(discrete_params, parameter_nets, LATENT)
    discrete_out, parameter_outs = net(latent)
    jax.block_until_ready((discrete_out, parameter_outs))

    # correctness check vs pure-jnp reference
    np.testing.assert_allclose(
        np.asarray(discrete_out),
        np.asarray(_ref_mlp(discrete_params, latent_discrete, "none")),
        rtol=1e-4, atol=1e-4)
    np.testing.assert_allclose(
        np.asarray(parameter_outs[0]),
        np.asarray(_ref_mlp(param_net0[1], latent_p0, "tanh")),
        rtol=1e-4, atol=1e-4)
    np.testing.assert_allclose(
        np.asarray(parameter_outs[1][0]),
        np.asarray(_ref_mlp(hybrid_sub[0][0], latent_h0, "none")),
        rtol=1e-4, atol=1e-4)
    np.testing.assert_allclose(
        np.asarray(parameter_outs[1][1]),
        np.asarray(_ref_mlp(hybrid_sub[1][0], latent_h1, "tanh")),
        rtol=1e-4, atol=1e-4)

    print("KERNEL_OK")
</pallas_src>

<mosaic_0001>
module attributes {stable_mosaic.version = 11 : i64} {
  func.func @_fused_heads_kernel(%arg0: i32, %arg1: memref<8x32xf32, #tpu.memory_space<vmem>>, %arg2: memref<8x32xf32, #tpu.memory_space<vmem>>, %arg3: memref<8x32xf32, #tpu.memory_space<vmem>>, %arg4: memref<8x32xf32, #tpu.memory_space<vmem>>, %arg5: memref<256x128xf32, #tpu.memory_space<vmem>>, %arg6: memref<2x128xf32, #tpu.memory_space<vmem>>, %arg7: memref<8x128xf32, #tpu.memory_space<vmem>>) attributes {dimension_semantics = [#tpu.dimension_semantics<parallel>], iteration_bounds = array<i64: 1>, scalar_prefetch = 0 : i64, scratch_operands = 0 : i64, tpu.core_type = #tpu.core_type<tc>, window_params = [{transform_indices = @transform_0, window_bounds = array<i64: 8, 32>}, {transform_indices = @transform_1, window_bounds = array<i64: 8, 32>}, {transform_indices = @transform_2, window_bounds = array<i64: 8, 32>}, {transform_indices = @transform_3, window_bounds = array<i64: 8, 32>}, {pipeline_mode = #tpu.pipeline_mode<synchronous>, transform_indices = @transform_4, window_bounds = array<i64: 256, 128>}, {pipeline_mode = #tpu.pipeline_mode<synchronous>, transform_indices = @transform_5, window_bounds = array<i64: 2, 128>}, {transform_indices = @transform_6, window_bounds = array<i64: 8, 128>}]} {
    %c0 = arith.constant 0 : index
    %c0_0 = arith.constant 0 : index
    %0 = vector.load %arg1[%c0, %c0_0] : memref<8x32xf32, #tpu.memory_space<vmem>>, vector<8x32xf32>
    %c0_1 = arith.constant 0 : index
    %c0_2 = arith.constant 0 : index
    %1 = vector.load %arg5[%c0_1, %c0_2] : memref<256x128xf32, #tpu.memory_space<vmem>>, vector<32x128xf32>
    %cst = arith.constant dense<0.000000e+00> : vector<8x128xf32>
    %2 = tpu.matmul %0, %1, %cst {dimension_numbers = #tpu.dot_dimension_numbers<[1], [0], [0], [1], [0, 0, 1, 1], [], []>} : vector<8x32xf32>, vector<32x128xf32>, vector<8x128xf32> -> vector<8x128xf32>
    %c0_3 = arith.constant 0 : index
    %c0_4 = arith.constant 0 : index
    %3 = vector.load %arg2[%c0_3, %c0_4] : memref<8x32xf32, #tpu.memory_space<vmem>>, vector<8x32xf32>
    %c32 = arith.constant 32 : index
    %c0_5 = arith.constant 0 : index
    %4 = vector.load %arg5[%c32, %c0_5] : memref<256x128xf32, #tpu.memory_space<vmem>>, vector<32x128xf32>
    %cst_6 = arith.constant dense<0.000000e+00> : vector<8x128xf32>
    %5 = tpu.matmul %3, %4, %cst_6 {dimension_numbers = #tpu.dot_dimension_numbers<[1], [0], [0], [1], [0, 0, 1, 1], [], []>} : vector<8x32xf32>, vector<32x128xf32>, vector<8x128xf32> -> vector<8x128xf32>
    %6 = arith.addf %2, %5 : vector<8x128xf32>
    %c0_7 = arith.constant 0 : index
    %c0_8 = arith.constant 0 : index
    %7 = vector.load %arg3[%c0_7, %c0_8] : memref<8x32xf32, #tpu.memory_space<vmem>>, vector<8x32xf32>
    %c64 = arith.constant 64 : index
    %c0_9 = arith.constant 0 : index
    %8 = vector.load %arg5[%c64, %c0_9] : memref<256x128xf32, #tpu.memory_space<vmem>>, vector<32x128xf32>
    %cst_10 = arith.constant dense<0.000000e+00> : vector<8x128xf32>
    %9 = tpu.matmul %7, %8, %cst_10 {dimension_numbers = #tpu.dot_dimension_numbers<[1], [0], [0], [1], [0, 0, 1, 1], [], []>} : vector<8x32xf32>, vector<32x128xf32>, vector<8x128xf32> -> vector<8x128xf32>
    %10 = arith.addf %6, %9 : vector<8x128xf32>
    %c0_11 = arith.constant 0 : index
    %c0_12 = arith.constant 0 : index
    %11 = vector.load %arg4[%c0_11, %c0_12] : memref<8x32xf32, #tpu.memory_space<vmem>>, vector<8x32xf32>
    %c96 = arith.constant 96 : index
    %c0_13 = arith.constant 0 : index
    %12 = vector.load %arg5[%c96, %c0_13] : memref<256x128xf32, #tpu.memory_space<vmem>>, vector<32x128xf32>
    %cst_14 = arith.constant dense<0.000000e+00> : vector<8x128xf32>
    %13 = tpu.matmul %11, %12, %cst_14 {dimension_numbers = #tpu.dot_dimension_numbers<[1], [0], [0], [1], [0, 0, 1, 1], [], []>} : vector<8x32xf32>, vector<32x128xf32>, vector<8x128xf32> -> vector<8x128xf32>
    %14 = arith.addf %10, %13 : vector<8x128xf32>
    %c0_15 = arith.constant 0 : index
    %c0_16 = arith.constant 0 : index
    %15 = vector.load %arg6[%c0_15, %c0_16] : memref<2x128xf32, #tpu.memory_space<vmem>>, vector<1x128xf32>
    %16 = vector.broadcast %15 : vector<1x128xf32> to vector<8x128xf32>
    %17 = arith.addf %14, %16 : vector<8x128xf32>
    %18 = tpu.iota {dimensions = array<i32: 1>} : vector<8x128xi32>
    %c0_i32 = arith.constant 0 : i32
    %19 = vector.broadcast %c0_i32 : i32 to vector<8x128xi32>
    %20 = arith.cmpi sge, %18, %19 : vector<8x128xi32>
    %c64_i32 = arith.constant 64 : i32
    %21 = vector.broadcast %c64_i32 : i32 to vector<8x128xi32>
    %22 = arith.cmpi slt, %18, %21 : vector<8x128xi32>
    %23 = arith.andi %20, %22 : vector<8x128xi1>
    %c68_i32 = arith.constant 68 : i32
    %24 = vector.broadcast %c68_i32 : i32 to vector<8x128xi32>
    %25 = arith.cmpi sge, %18, %24 : vector<8x128xi32>
    %c100_i32 = arith.constant 100 : i32
    %26 = vector.broadcast %c100_i32 : i32 to vector<8x128xi32>
    %27 = arith.cmpi slt, %18, %26 : vector<8x128xi32>
    %28 = arith.andi %25, %27 : vector<8x128xi1>
    %29 = arith.ori %23, %28 : vector<8x128xi1>
    %cst_17 = arith.constant 0.000000e+00 : f32
    %30 = vector.broadcast %cst_17 : f32 to vector<8x128xf32>
    %31 = arith.maximumf %17, %30 : vector<8x128xf32>
    %32 = arith.select %29, %31, %17 : vector<8x128xi1>, vector<8x128xf32>
    %c128 = arith.constant 128 : index
    %c0_18 = arith.constant 0 : index
    %33 = vector.load %arg5[%c128, %c0_18] : memref<256x128xf32, #tpu.memory_space<vmem>>, vector<128x128xf32>
    %cst_19 = arith.constant dense<0.000000e+00> : vector<8x128xf32>
    %34 = tpu.matmul %32, %33, %cst_19 {dimension_numbers = #tpu.dot_dimension_numbers<[1], [0], [0], [1], [0, 0, 1, 1], [], []>} : vector<8x128xf32>, vector<128x128xf32>, vector<8x128xf32> -> vector<8x128xf32>
    %c1 = arith.constant 1 : index
    %c0_20 = arith.constant 0 : index
    %35 = vector.load %arg6[%c1, %c0_20] : memref<2x128xf32, #tpu.memory_space<vmem>>, vector<1x128xf32>
    %36 = vector.broadcast %35 : vector<1x128xf32> to vector<8x128xf32>
    %37 = arith.addf %34, %36 : vector<8x128xf32>
    %38 = tpu.iota {dimensions = array<i32: 1>} : vector<8x128xi32>
    %c5_i32 = arith.constant 5 : i32
    %39 = vector.broadcast %c5_i32 : i32 to vector<8x128xi32>
    %40 = arith.cmpi sge, %38, %39 : vector<8x128xi32>
    %c8_i32 = arith.constant 8 : i32
    %41 = vector.broadcast %c8_i32 : i32 to vector<8x128xi32>
    %42 = arith.cmpi slt, %38, %41 : vector<8x128xi32>
    %43 = arith.andi %40, %42 : vector<8x128xi1>
    %c12_i32 = arith.constant 12 : i32
    %44 = vector.broadcast %c12_i32 : i32 to vector<8x128xi32>
    %45 = arith.cmpi sge, %38, %44 : vector<8x128xi32>
    %c14_i32 = arith.constant 14 : i32
    %46 = vector.broadcast %c14_i32 : i32 to vector<8x128xi32>
    %47 = arith.cmpi slt, %38, %46 : vector<8x128xi32>
    %48 = arith.andi %45, %47 : vector<8x128xi1>
    %49 = arith.ori %43, %48 : vector<8x128xi1>
    %50 = math.tanh %37 : vector<8x128xf32>
    %51 = arith.select %49, %50, %37 : vector<8x128xi1>, vector<8x128xf32>
    %c0_21 = arith.constant 0 : index
    %c0_22 = arith.constant 0 : index
    %52 = vector.load %arg7[%c0_21, %c0_22] : memref<8x128xf32, #tpu.memory_space<vmem>>, vector<8x128xf32>
    tpu.vector_store %arg7[%c0_21, %c0_22], %51 {strides = array<i32>} : memref<8x128xf32, #tpu.memory_space<vmem>>, vector<8x128xf32>,
    return
  }
  func.func @transform_0(%arg0: i32) -> (i32, i32) {
    %c0_i32 = arith.constant 0 : i32
    %c0_i32_0 = arith.constant 0 : i32
    return %arg0, %c0_i32 : i32, i32
  }
  func.func @transform_1(%arg0: i32) -> (i32, i32) {
    %c0_i32 = arith.constant 0 : i32
    %c0_i32_0 = arith.constant 0 : i32
    return %arg0, %c0_i32 : i32, i32
  }
  func.func @transform_2(%arg0: i32) -> (i32, i32) {
    %c0_i32 = arith.constant 0 : i32
    %c0_i32_0 = arith.constant 0 : i32
    return %arg0, %c0_i32 : i32, i32
  }
  func.func @transform_3(%arg0: i32) -> (i32, i32) {
    %c0_i32 = arith.constant 0 : i32
    %c0_i32_0 = arith.constant 0 : i32
    return %arg0, %c0_i32 : i32, i32
  }
  func.func @transform_4(%arg0: i32) -> (i32, i32) {
    %c0_i32 = arith.constant 0 : i32
    %c0_i32_0 = arith.constant 0 : i32
    %c0_i32_1 = arith.constant 0 : i32
    return %c0_i32, %c0_i32_0 : i32, i32
  }
  func.func @transform_5(%arg0: i32) -> (i32, i32) {
    %c0_i32 = arith.constant 0 : i32
    %c0_i32_0 = arith.constant 0 : i32
    %c0_i32_1 = arith.constant 0 : i32
    return %c0_i32, %c0_i32_0 : i32, i32
  }
  func.func @transform_6(%arg0: i32) -> (i32, i32) {
    %c0_i32 = arith.constant 0 : i32
    %c0_i32_0 = arith.constant 0 : i32
    return %arg0, %c0_i32 : i32, i32
  }
}

</mosaic_0001>

<bundles_post_ra>
// kernel: _forward_flat.1
= control target key start
LH: loop header
LB: loop body
LE: loop exit
PB: predicated region body
PF: predicated region fallthrough
CT: control target
= control target key end

     0   :  { %11 = vsyncpa [#allocation3], 0  ;;  %s528_s0 = inlined_call_operand.hbm [shape: f32[8,32], index: 0, kind: input, shape index: {}]   ;;  %s529_s1 = inlined_call_operand.hbm [shape: f32[8,32], index: 1, kind: input, shape index: {}]   ;;  %s530_s2 = inlined_call_operand.hbm [shape: f32[8,32], index: 2, kind: input, shape index: {}]   ;;  %s531_s3 = inlined_call_operand.hbm [shape: f32[8,32], index: 3, kind: input, shape index: {}]   ;;  %s532_s4 = inlined_call_operand.hbm [shape: f32[256,128], index: 4, kind: input, shape index: {}]   ;;  %s533_s5 = inlined_call_operand.hbm [shape: f32[2,128], index: 5, kind: input, shape index: {}]   ;;  %s534_s6 = inlined_call_operand.vmem [shape: f32[8,128], index: 6, kind: output, shape index: {}]  }
   0x1   :  { %12 = vsyncpa [#allocation5], 0 }
   0x2   :  { %13 = vsyncpa [#allocation8], 0  ;;  %s31_s23 = sshll.u32 %s529_s1, 4  ;;  %s32_s23 = int_to_ptr.hbm [resolvable:$true] %s31_s23 }
   0x3   :  { %14 = vsyncpa [#allocation11], 0  ;;  %s460_s24 = smov [#allocation4]   ;;  %s53_s28 = sshll.u32 %s531_s3, 4  ;;  %s54_s28 = int_to_ptr.hbm [resolvable:$true] %s53_s28 }
   0x4   :  { %s33_s25 = sshll.u32 %s460_s24, 4  ;;  %s461_s29 = smov [#allocation7]   ;;  %s34_s25 = int_to_ptr.vmem [resolvable:$true] %s33_s25 }
   0x5   :  { %36 = dma.hbm_to_vmem [thread:$0]  %s32_s23, 128, %s34_s25, [#allocation5]  }
   0x6   :  { %s55_s30 = sshll.u32 %s461_s29, 4  ;;  %s20_s9 = sshll.u32 %s528_s0, 4  ;;  %s56_s30 = int_to_ptr.vmem [resolvable:$true] %s55_s30  ;;  %s21_s9 = int_to_ptr.hbm [resolvable:$true] %s20_s9 }
   0x7   :  { %58 = dma.hbm_to_vmem [thread:$0]  %s54_s28, 128, %s56_s30, [#allocation8]  }
   0x8   :  { %s42_s11 = sshll.u32 %s530_s2, 4  ;;  %s462_s12 = smov [#allocation2]   ;;  %s43_s11 = int_to_ptr.hbm [resolvable:$true] %s42_s11 }
   0x9   :  { %s22_s13 = sshll.u32 %s462_s12, 4  ;;  %s463_s3 = smov [#allocation6]   ;;  %s23_s13 = int_to_ptr.vmem [resolvable:$true] %s22_s13 }
   0xa   :  { %25 = dma.hbm_to_vmem [thread:$0]  %s21_s9, 128, %s23_s13, [#allocation3]  }
   0xb   :  { %s44_s14 = sshll.u32 %s463_s3, 4  ;;  %s63_s17 = sshll.u32 %s532_s4, 4  ;;  %s45_s14 = int_to_ptr.vmem [resolvable:$true] %s44_s14  ;;  %s64_s17 = int_to_ptr.hbm [resolvable:$true] %s63_s17 }
   0xc   :  { %47 = dma.hbm_to_vmem [thread:$0]  %s43_s11, 128, %s45_s14, [#allocation5]  }
   0xd   :  { %s464_s0 = smov [#allocation9]   ;;  %s77_s2 = sshll.u32 %s533_s5, 4  ;;  %s78_s2 = int_to_ptr.hbm [resolvable:$true] %s77_s2 }
   0xe   :  { %s65_s18 = sshll.u32 %s464_s0, 4  ;;  %s465_s21 = smov 128   ;;  %s66_s18 = int_to_ptr.vmem [resolvable:$true] %s65_s18 }
   0xf   :  { %s466_s22 = smov 8   ;;  %s467_s23 = smov [#allocation10]  }
  0x10   :  { %71 = dma.hbm_to_vmem [thread:$0]  %s64_s17, 4096, %s66_s18, [#allocation8], %s465_s21, %s465_s21, %s466_s22  }
  0x11   :  { %s79_s24 = sshll.u32 %s467_s23, 4  ;;  %s80_s24 = int_to_ptr.vmem [resolvable:$true] %s79_s24 }
  0x12   :  { %82 = dma.hbm_to_vmem [thread:$0]  %s78_s2, 32, %s80_s24, [#allocation11]  }
  0x13   :  { %452 = dma.done.wait [#allocation3], 128  }
  0x14   :  { %453 = vsyncadd [#allocation3], 4294967168 }
  0x15   :  { %454 = dma.done.wait [#allocation5], 256  }
  0x16   :  { %455 = vsyncadd [#allocation5], 4294967040 }
  0x17   :  { %456 = dma.done.wait [#allocation8], 4224  }
  0x18   :  { %457 = vsyncadd [#allocation8], 4294963072 }
  0x19   :  { %458 = dma.done.wait [#allocation11], 32  }
  0x1a   :  { %459 = vsyncadd [#allocation11], 4294967264  ;;  %v116_v0 = vld [vmem:[#allocation9 + $0x38] sm:$0xff]  ;;  %v115_v1 = vld [vmem:[#allocation9 + $0x30] sm:$0xff]  ;;  %vm117_vm0 = vcmask 261120   ;;  %v225_v37 = vlaneseq }
  0x1b   :  { %133 = vmatpush.msra.mxu1 %v116_v0  ;;  %v168_v2 = vld [vmem:[#allocation9 + $0x58] sm:$0xff]  ;;  %v167_v3 = vld [vmem:[#allocation9 + $0x50] sm:$0xff]  ;;  %v114_v4 = vld [vmem:[#allocation9 + $0x28] sm:$0xff] }
  0x1c   :  { %184 = vmatpush.msra.mxu2 %v168_v2  ;;  %v197_v5 = vld [vmem:[#allocation9 + $0x78] sm:$0xff]  ;;  %v166_v6 = vld [vmem:[#allocation9 + $0x48] sm:$0xff]  ;;  %v196_v7 = vld [vmem:[#allocation9 + $0x70] sm:$0xff]  ;;  %v226_v38 = vand.u32 127, %v225_v37 }
  0x1d   :  { %134 = vmatpush.msra.mxu1 %v115_v1  ;;  %213 = vmatpush.msra.mxu3 %v197_v5  ;;  %v113_v8 = vld [vmem:[#allocation9 + $0x20] sm:$0xff]  ;;  %v195_v9 = vld [vmem:[#allocation9 + $0x68] sm:$0xff]  ;;  %v111_v12 = vld [vmem:[#allocation9 + $0x18] sm:$0xff] }
  0x1e   :  { %185 = vmatpush.msra.mxu2 %v167_v3  ;;  %v112_v10 = vld [vmem:[#allocation4] sm:$0xff]  ;;  %v165_v11 = vld [vmem:[#allocation9 + $0x40] sm:$0xff]  ;;  %v164_v13 = vld [vmem:[#allocation6] sm:$0xff]  ;;  %vm230_vm1 = vcmp.ge.s32.totalorder %v226_v38, 68  ;;  %vm231_vm2 = vcmp.lt.s32.totalorder %v226_v38, 100  ;;  %vm228_vm3 = vcmp.lt.s32.totalorder %v226_v38, 64 }
  0x1f   :  { %135 = vmatpush.msra.mxu1 %v114_v4  ;;  %214 = vmatpush.msra.mxu3 %v196_v7  ;;  %v194_v14 = vld [vmem:[#allocation9 + $0x60] sm:$0xff]  ;;  %v251_v15 = vld [vmem:[#allocation9 + $0xf8] sm:$0xff]  ;;  %v110_v16 = vld [vmem:[#allocation9 + $0x10] sm:$0xff]  ;;  %vm274_vm6 = vcmp.ge.s32.totalorder %v226_v38, 5  ;;  %vm275_vm7 = vcmp.lt.s32.totalorder %v226_v38, 8  ;;  %vm277_vm8 = vcmp.ge.s32.totalorder %v226_v38, 12 }
  0x20   :  { %186 = vmatpush.msra.mxu2 %v166_v6  ;;  %v193_v17 = vld [vmem:[#allocation7] sm:$0xff]  ;;  %v250_v18 = vld [vmem:[#allocation9 + $0xf0] sm:$0xff]  ;;  %v109_v19 = vld [vmem:[#allocation9 + $0x8] sm:$0xff]  ;;  %254 = vmatpush.msra.mxu0 %v251_v15  ;;  %vm278_vm9 = vcmp.lt.s32.totalorder %v226_v38, 14 }
  0x21   :  { %136 = vmatpush.msra.mxu1 %v113_v8  ;;  %215 = vmatpush.msra.mxu3 %v195_v9  ;;  %v249_v20 = vld [vmem:[#allocation9 + $0xe8] sm:$0xff]  ;;  %v108_v21 = vld [vmem:[#allocation9] sm:$0xff]  ;;  %v247_v24 = vld [vmem:[#allocation9 + $0xd8] sm:$0xff] }
  0x22   :  { %292 = vmatmul.msk.f32.vlgmr.msra.gmra.mxu1 %vm117_vm0, %v112_v10  ;;  %187 = vmatpush.msra.mxu2 %v165_v11  ;;  %v107_v22 = vld [vmem:[#allocation2] sm:$0xff]  ;;  %v246_v25 = vld [vmem:[#allocation9 + $0xd0] sm:$0xff]  ;;  %v245_v26 = vld [vmem:[#allocation9 + $0xc8] sm:$0xff] }
  0x23   :  { %156 = vmatpush.msrb.mxu1 %v111_v12  ;;  %294 = vmatmul.msk.f32.vlgmr.msra.gmra.mxu2 %vm117_vm0, %v164_v13  ;;  %v248_v23 = vld [vmem:[#allocation9 + $0xe0] sm:$0xff]  ;;  %v243_v28 = vld [vmem:[#allocation9 + $0xb8] sm:$0xff]  ;;  %v242_v29 = vld [vmem:[#allocation9 + $0xb0] sm:$0xff] }
  0x24   :  { %216 = vmatpush.msra.mxu3 %v194_v14  ;;  %255 = vmatpush.msra.mxu0 %v250_v18  ;;  %v244_v27 = vld [vmem:[#allocation9 + $0xc0] sm:$0xff]  ;;  %v241_v30 = vld [vmem:[#allocation9 + $0xa8] sm:$0xff]  ;;  %v239_v32 = vld [vmem:[#allocation9 + $0x98] sm:$0xff] }
  0x25   :  { %157 = vmatpush.msrb.mxu1 %v110_v16  ;;  %295 = vmatmul.msk.f32.vlgmr.msra.gmra.mxu3 %vm117_vm0, %v193_v17  ;;  %v240_v31 = vld [vmem:[#allocation9 + $0xa0] sm:$0xff]  ;;  %v238_v33 = vld [vmem:[#allocation9 + $0x90] sm:$0xff]  ;;  %v237_v34 = vld [vmem:[#allocation9 + $0x88] sm:$0xff] }
  0x26   :  { %256 = vmatpush.msra.mxu0 %v249_v20  ;;  %v236_v35 = vld [vmem:[#allocation9 + $0x80] sm:$0xff]  ;;  %vm232_vm4 = vmand %vm230_vm1, %vm231_vm2 }
  0x27   :  { %158 = vmatpush.msrb.mxu1 %v109_v19  ;;  %v304_v44 = vld [vmem:[#allocation10] ss:$0 sm:$0xff]  ;;  %vm233_vm5 = vmor %vm228_vm3, %vm232_vm4  ;;  %v305_v49 = vld [vmem:[#allocation10 + $0x1] ss:$0 sm:$0xff] }
  0x28   :  { %257 = vmatpush.msra.mxu0 %v248_v23  ;;  %vm276_vm10 = vmand %vm274_vm6, %vm275_vm7 }
  0x29   :  { %159 = vmatpush.msrb.mxu1 %v108_v21  ;;  %vm279_vm11 = vmand %vm277_vm8, %vm278_vm9 }
  0x2a   :  { %293 = vmatmul.msk.f32.vlgmr.msrb.gmra.mxu1 %vm117_vm0, %v107_v22  ;;  %258 = vmatpush.msra.mxu0 %v247_v24  ;;  %vm280_vm12 = vmor %vm276_vm10, %vm279_vm11 }
  0x2c   :  { %259 = vmatpush.msra.mxu0 %v246_v25 }
  0x2e   :  { %260 = vmatpush.msra.mxu0 %v245_v26 }
  0x30   :  { %261 = vmatpush.msra.mxu0 %v244_v27 }
  0x32   :  { %262 = vmatpush.msra.mxu0 %v243_v28 }
  0x34   :  { %263 = vmatpush.msra.mxu0 %v242_v29 }
  0x36   :  { %264 = vmatpush.msra.mxu0 %v241_v30 }
  0x38   :  { %265 = vmatpush.msra.mxu0 %v240_v31 }
  0x3a   :  { %266 = vmatpush.msra.mxu0 %v239_v32 }
  0x3c   :  { %267 = vmatpush.msra.mxu0 %v238_v33 }
  0x3e   :  { %268 = vmatpush.msra.mxu0 %v237_v34 }
  0x40   :  { %269 = vmatpush.msra.mxu0 %v236_v35 }
  0x9f   :  { %v138_v36 = vpop.f32.mrf.mxu1 }
  0xa6   :  { %v189_v40 = vpop.f32.mrf.mxu2 }
  0xa7   :  { %v161_v39 = vpop.f32.mrf.mxu1 }
  0xa8   :  { %v162_v41 = vadd.f32 %v161_v39, %v138_v36  ;;  %v218_v42 = vpop.f32.mrf.mxu3 }
  0xaa   :  { %v192_v43 = vadd.f32 %v189_v40, %v162_v41 }
  0xac   :  { %v221_v45 = vadd.f32 %v218_v42, %v192_v43 }
  0xae   :  { %v224_v46 = vadd.f32 %v304_v44, %v221_v45 }
  0xb0   :  { %v234_v47 = vmax.f32 %v224_v46, 0.0 }
  0xb2   :  { %v235_v48 = vsel %vm233_vm5, %v234_v47, %v224_v46 }
  0xb3   :  { %270 = vmatmul.f32.vlgmr.msra.gmra.mxu0 %v235_v48 }
 0x130   :  { %v271_v50 = vpop.f32.mrf.mxu0 }
 0x131   :  { %v272_v51 = vadd.f32 %v305_v49, %v271_v50 }
 0x133   :  { %306 = vtanh.f32 %v272_v51 }
 0x139   :  { %v307_v52 = vpop.eup %306 }
 0x13a   :  { %v282_v53 = vsel %vm280_vm12, %v307_v52, %v272_v51 }
 0x13b   :  { %283 = vst [vmem:[%s534_s6] sm:$0xff] %v282_v53 }
 0x13c   :  { %288 = vsyncpa [#allocation3], 1 }
 0x13d   :  { %289 = vsyncpa [#allocation5], 1 }
 0x13e   :  { %290 = vsyncpa [#allocation8], 1 }
 0x13f   :  { %291 = vsyncpa [#allocation11], 1 }

</bundles_post_ra>
